<compile_context>
chip_gen: v5e
topology: v5e:2x2
jax: 0.10.0
libtpu: 0.0.40
codegen_flags: <defaults>
</compile_context>

<pallas_src>
import functools

import jax
import jax.numpy as jnp
from jax.experimental import pallas as pl
from jax.experimental.pallas import tpu as pltpu


def _ffn_kernel(x_ref, w1_ref, b1_ref, w2_ref, b2_ref, o_ref, acc_ref):
    j = pl.program_id(1)

    @pl.when(j == 0)
    def _init():
        acc_ref[...] = jnp.zeros_like(acc_ref)

    # dense_input, partial over this I-tile: (tm, H) @ (H, ti) -> (tm, ti), f32 on MXU.
    inter = jnp.dot(x_ref[...], w1_ref[...], preferred_element_type=jnp.float32)
    inter = inter + b1_ref[...]                        # b1 added once per fresh I-tile
    # dropout (eval mode): identity.
    inter = jnp.where(inter > 0, inter, 0.01 * inter)  # LeakyReLU(negative_slope=0.01)

    # dense_output partial sum: (tm, ti) @ (ti, H) -> (tm, H), f32 accumulation.
    acc_ref[...] += jnp.dot(inter.astype(w2_ref.dtype), w2_ref[...],
                            preferred_element_type=jnp.float32)

    @pl.when(j == pl.num_programs(1) - 1)
    def _finalize():
        o_ref[...] = (acc_ref[...] + b2_ref[...]).astype(o_ref.dtype)


def _round_up(x, m):
    return (x + m - 1) // m * m


def _pick_inner_tile(total, target, align=128):
    """Largest multiple of `align` that divides `total` and is <= target, else `total`."""
    if total <= target or total % align != 0:
        return total
    t = (target // align) * align
    while t >= align:
        if total % t == 0:
            return t
        t -= align
    return total


@functools.partial(
    jax.jit, static_argnames=("tm", "ti", "compute_dtype", "vmem_limit_bytes"))
def feed_forward(x, w1, b1, w2, b2, *, tm=256, ti=512, compute_dtype=None,
                 vmem_limit_bytes=64 * 1024 * 1024):
    """x: [..., H] -> [..., H].  w1: [H, I], b1: [I], w2: [I, H], b2: [H].

    compute_dtype: optionally cast x / W1 / W2 (e.g. jnp.bfloat16 on v6e/v7x);
    accumulation and bias/activation math stay in f32, output keeps x.dtype.
    """
    orig_shape = x.shape
    out_dtype = x.dtype
    H = orig_shape[-1]
    I = w1.shape[1]

    x2d = x.reshape(-1, H)
    N = x2d.shape[0]

    # Row tile: MXU-sized by default, clamped + zero-padded for small/ragged N.
    tm_eff = min(tm, _round_up(N, 8))
    n_pad = _round_up(N, tm_eff)
    if n_pad != N:
        x2d = jnp.pad(x2d, ((0, n_pad - N), (0, 0)))

    # Intermediate-dim tile: lane-aligned (multiple of 128) divisor of I, or full I.
    ti_eff = _pick_inner_tile(I, ti, align=128)

    if compute_dtype is not None:
        x2d = x2d.astype(compute_dtype)
        w1 = w1.astype(compute_dtype)
        w2 = w2.astype(compute_dtype)

    # Biases stay f32: they are added onto f32 intermediates/accumulators.
    b1_2d = b1.astype(jnp.float32).reshape(1, I)
    b2_2d = b2.astype(jnp.float32).reshape(1, H)

    grid = (n_pad // tm_eff, I // ti_eff)

    out = pl.pallas_call(
        _ffn_kernel,
        out_shape=jax.ShapeDtypeStruct((n_pad, H), out_dtype),
        grid_spec=pltpu.PrefetchScalarGridSpec(
            num_scalar_prefetch=0,
            grid=grid,
            in_specs=[
                pl.BlockSpec((tm_eff, H), lambda i, j: (i, 0)),   # x tile (reused over j)
                pl.BlockSpec((H, ti_eff), lambda i, j: (0, j)),   # W1 I-slice (streamed)
                pl.BlockSpec((1, ti_eff), lambda i, j: (0, j)),   # b1 I-slice
                pl.BlockSpec((ti_eff, H), lambda i, j: (j, 0)),   # W2 I-slice (streamed)
                pl.BlockSpec((1, H), lambda i, j: (0, 0)),        # b2 (tiny, resident)
            ],
            out_specs=pl.BlockSpec((tm_eff, H), lambda i, j: (i, 0)),
            scratch_shapes=[pltpu.VMEM((tm_eff, H), jnp.float32)],  # f32 accumulator
        ),
        compiler_params=pltpu.CompilerParams(
            dimension_semantics=("parallel", "arbitrary"),
            vmem_limit_bytes=vmem_limit_bytes,
        ),
    )(x2d, w1, b1_2d, w2, b2_2d)

    if n_pad != N:
        out = out[:N]
    return out.reshape(orig_shape)


def _init_linear(key, in_features, out_features, dtype=jnp.float32):
    # Deterministic init mimicking nn.Linear (uniform +/- 1/sqrt(in_features)).
    kw, kb = jax.random.split(key)
    bound = 1.0 / (in_features ** 0.5)
    # Stored transposed relative to PyTorch: [in, out]
    w = jax.random.uniform(kw, (in_features, out_features), dtype, -bound, bound)
    b = jax.random.uniform(kb, (out_features,), dtype, -bound, bound)
    return w, b


def _reference(x, w1, b1, w2, b2):
    inter = x @ w1 + b1
    inter = jnp.where(inter > 0, inter, 0.01 * inter)
    return inter @ w2 + b2


if __name__ == "__main__":
    hidden, intermediate = 32, 64

    key = jax.random.PRNGKey(0)
    k_x, k_l1, k_l2, k_x2 = jax.random.split(key, 4)

    w1, b1 = _init_linear(k_l1, hidden, intermediate)        # dense_input
    w2, b2 = _init_linear(k_l2, intermediate, hidden)        # dense_output

    # Case 1: small standard shape (token count multiple of 8).
    x = jax.random.normal(k_x, (2, 8, hidden), jnp.float32)
    out = jax.block_until_ready(feed_forward(x, w1, b1, w2, b2))
    ref = _reference(x, w1, b1, w2, b2)
    assert out.shape == x.shape
    assert jnp.allclose(out, ref, atol=1e-5, rtol=1e-5)

    # Case 2: ragged token count (exercises wrapper padding / tail handling).
    x2 = jax.random.normal(k_x2, (3, 5, hidden), jnp.float32)
    out2 = jax.block_until_ready(feed_forward(x2, w1, b1, w2, b2))
    ref2 = _reference(x2, w1, b1, w2, b2)
    assert out2.shape == x2.shape
    assert jnp.allclose(out2, ref2, atol=1e-5, rtol=1e-5)

    print("KERNEL_OK")
</pallas_src>

<mosaic_0001>
module attributes {stable_mosaic.version = 11 : i64} {
  func.func @_ffn_kernel(%arg0: i32, %arg1: i32, %arg2: memref<16x32xf32, #tpu.memory_space<vmem>>, %arg3: memref<32x64xf32, #tpu.memory_space<vmem>>, %arg4: memref<1x64xf32, #tpu.memory_space<vmem>>, %arg5: memref<64x32xf32, #tpu.memory_space<vmem>>, %arg6: memref<1x32xf32, #tpu.memory_space<vmem>>, %arg7: memref<16x32xf32, #tpu.memory_space<vmem>>, %arg8: memref<16x32xf32, #tpu.memory_space<vmem>>) attributes {dimension_semantics = [#tpu.dimension_semantics<parallel>, #tpu.dimension_semantics<arbitrary>], iteration_bounds = array<i64: 1, 1>, scalar_prefetch = 0 : i64, scratch_operands = 1 : i64, tpu.core_type = #tpu.core_type<tc>, window_params = [{transform_indices = @transform_0, window_bounds = array<i64: 16, 32>}, {transform_indices = @transform_1, window_bounds = array<i64: 32, 64>}, {transform_indices = @transform_2, window_bounds = array<i64: 1, 64>}, {transform_indices = @transform_3, window_bounds = array<i64: 64, 32>}, {pipeline_mode = #tpu.pipeline_mode<synchronous>, transform_indices = @transform_4, window_bounds = array<i64: 1, 32>}, {transform_indices = @transform_5, window_bounds = array<i64: 16, 32>}]} {
    %c0_i32 = arith.constant 0 : i32
    %0 = arith.cmpi eq, %arg1, %c0_i32 : i32
    %1 = arith.extui %0 : i1 to i32
    %c0_i32_0 = arith.constant 0 : i32
    %2 = arith.cmpi ne, %1, %c0_i32_0 : i32
    scf.if %2 {
      %cst_17 = arith.constant 0.000000e+00 : f32
      %22 = vector.broadcast %cst_17 : f32 to vector<16x32xf32>
      %c0_18 = arith.constant 0 : index
      %c0_19 = arith.constant 0 : index
      %23 = vector.load %arg8[%c0_18, %c0_19] : memref<16x32xf32, #tpu.memory_space<vmem>>, vector<16x32xf32>
      tpu.vector_store %arg8[%c0_18, %c0_19], %22 {strides = array<i32>} : memref<16x32xf32, #tpu.memory_space<vmem>>, vector<16x32xf32>,
    } else {
    }
    %c0 = arith.constant 0 : index
    %c0_1 = arith.constant 0 : index
    %3 = vector.load %arg2[%c0, %c0_1] : memref<16x32xf32, #tpu.memory_space<vmem>>, vector<16x32xf32>
    %c0_2 = arith.constant 0 : index
    %c0_3 = arith.constant 0 : index
    %4 = vector.load %arg3[%c0_2, %c0_3] : memref<32x64xf32, #tpu.memory_space<vmem>>, vector<32x64xf32>
    %cst = arith.constant dense<0.000000e+00> : vector<16x64xf32>
    %5 = tpu.matmul %3, %4, %cst {dimension_numbers = #tpu.dot_dimension_numbers<[1], [0], [0], [1], [0, 0, 1, 1], [], []>} : vector<16x32xf32>, vector<32x64xf32>, vector<16x64xf32> -> vector<16x64xf32>
    %c0_4 = arith.constant 0 : index
    %c0_5 = arith.constant 0 : index
    %6 = vector.load %arg4[%c0_4, %c0_5] : memref<1x64xf32, #tpu.memory_space<vmem>>, vector<1x64xf32>
    %7 = vector.broadcast %6 : vector<1x64xf32> to vector<16x64xf32>
    %8 = arith.addf %5, %7 : vector<16x64xf32>
    %cst_6 = arith.constant 0.000000e+00 : f32
    %9 = vector.broadcast %cst_6 : f32 to vector<16x64xf32>
    %10 = arith.cmpf ogt, %8, %9 : vector<16x64xf32>
    %cst_7 = arith.constant 0.00999999977 : f32
    %11 = vector.broadcast %cst_7 : f32 to vector<16x64xf32>
    %12 = arith.mulf %11, %8 : vector<16x64xf32>
    %13 = arith.select %10, %8, %12 : vector<16x64xi1>, vector<16x64xf32>
    %c0_8 = arith.constant 0 : index
    %c0_9 = arith.constant 0 : index
    %14 = vector.load %arg8[%c0_8, %c0_9] : memref<16x32xf32, #tpu.memory_space<vmem>>, vector<16x32xf32>
    %c0_10 = arith.constant 0 : index
    %c0_11 = arith.constant 0 : index
    %15 = vector.load %arg5[%c0_10, %c0_11] : memref<64x32xf32, #tpu.memory_space<vmem>>, vector<64x32xf32>
    %cst_12 = arith.constant dense<0.000000e+00> : vector<16x32xf32>
    %16 = tpu.matmul %13, %15, %cst_12 {dimension_numbers = #tpu.dot_dimension_numbers<[1], [0], [0], [1], [0, 0, 1, 1], [], []>} : vector<16x64xf32>, vector<64x32xf32>, vector<16x32xf32> -> vector<16x32xf32>
    %17 = arith.addf %14, %16 : vector<16x32xf32>
    %c0_13 = arith.constant 0 : index
    %c0_14 = arith.constant 0 : index
    %18 = vector.load %arg8[%c0_13, %c0_14] : memref<16x32xf32, #tpu.memory_space<vmem>>, vector<16x32xf32>
    tpu.vector_store %arg8[%c0_13, %c0_14], %17 {strides = array<i32>} : memref<16x32xf32, #tpu.memory_space<vmem>>, vector<16x32xf32>,
    %c0_i32_15 = arith.constant 0 : i32
    %19 = arith.cmpi eq, %arg1, %c0_i32_15 : i32
    %20 = arith.extui %19 : i1 to i32
    %c0_i32_16 = arith.constant 0 : i32
    %21 = arith.cmpi ne, %20, %c0_i32_16 : i32
    scf.if %21 {
      %c0_17 = arith.constant 0 : index
      %c0_18 = arith.constant 0 : index
      %22 = vector.load %arg8[%c0_17, %c0_18] : memref<16x32xf32, #tpu.memory_space<vmem>>, vector<16x32xf32>
      %c0_19 = arith.constant 0 : index
      %c0_20 = arith.constant 0 : index
      %23 = vector.load %arg6[%c0_19, %c0_20] : memref<1x32xf32, #tpu.memory_space<vmem>>, vector<1x32xf32>
      %24 = vector.broadcast %23 : vector<1x32xf32> to vector<16x32xf32>
      %25 = arith.addf %22, %24 : vector<16x32xf32>
      %c0_21 = arith.constant 0 : index
      %c0_22 = arith.constant 0 : index
      %26 = vector.load %arg7[%c0_21, %c0_22] : memref<16x32xf32, #tpu.memory_space<vmem>>, vector<16x32xf32>
      tpu.vector_store %arg7[%c0_21, %c0_22], %25 {strides = array<i32>} : memref<16x32xf32, #tpu.memory_space<vmem>>, vector<16x32xf32>,
    } else {
    }
    return
  }
  func.func @transform_0(%arg0: i32, %arg1: i32) -> (i32, i32) {
    %c0_i32 = arith.constant 0 : i32
    %c0_i32_0 = arith.constant 0 : i32
    return %arg0, %c0_i32 : i32, i32
  }
  func.func @transform_1(%arg0: i32, %arg1: i32) -> (i32, i32) {
    %c0_i32 = arith.constant 0 : i32
    %c0_i32_0 = arith.constant 0 : i32
    return %c0_i32, %arg1 : i32, i32
  }
  func.func @transform_2(%arg0: i32, %arg1: i32) -> (i32, i32) {
    %c0_i32 = arith.constant 0 : i32
    %c0_i32_0 = arith.constant 0 : i32
    return %c0_i32, %arg1 : i32, i32
  }
  func.func @transform_3(%arg0: i32, %arg1: i32) -> (i32, i32) {
    %c0_i32 = arith.constant 0 : i32
    %c0_i32_0 = arith.constant 0 : i32
    return %arg1, %c0_i32 : i32, i32
  }
  func.func @transform_4(%arg0: i32, %arg1: i32) -> (i32, i32) {
    %c0_i32 = arith.constant 0 : i32
    %c0_i32_0 = arith.constant 0 : i32
    %c0_i32_1 = arith.constant 0 : i32
    return %c0_i32, %c0_i32_0 : i32, i32
  }
  func.func @transform_5(%arg0: i32, %arg1: i32) -> (i32, i32) {
    %c0_i32 = arith.constant 0 : i32
    %c0_i32_0 = arith.constant 0 : i32
    return %arg0, %c0_i32 : i32, i32
  }
}

</mosaic_0001>

<bundles_post_ra>
// kernel: feed_forward.1
= control target key start
LH: loop header
LB: loop body
LE: loop exit
PB: predicated region body
PF: predicated region fallthrough
CT: control target
= control target key end

     0   :  { %s290_s0 = inlined_call_operand.vmem [shape: f32[16,32], index: 0, kind: input, shape index: {}]   ;;  %s291_s1 = inlined_call_operand.vmem [shape: f32[32,64], index: 1, kind: input, shape index: {}]   ;;  %s292_s2 = inlined_call_operand.vmem [shape: f32[1,64], index: 2, kind: input, shape index: {}]   ;;  %s293_s3 = inlined_call_operand.vmem [shape: f32[64,32], index: 3, kind: input, shape index: {}]   ;;  %s294_s4 = inlined_call_operand.vmem [shape: f32[1,32], index: 4, kind: input, shape index: {}]   ;;  %s295_s5 = inlined_call_operand.hbm [shape: f32[16,32], index: 5, kind: output, shape index: {}]  }
   0x1   :  { %v33_v0 = vld [vmem:[%s291_s1 + $0x18] sm:$0xff]  ;;  %v32_v1 = vld [vmem:[%s291_s1 + $0x10] sm:$0xff]  ;;  %v31_v2 = vld [vmem:[%s291_s1 + $0x8] sm:$0xff] }
   0x2   :  { %153 = vmatpush.msra.mxu3 %v33_v0  ;;  %57 = vmatpush.msra.mxu0 %v33_v0  ;;  %v83_v3 = vld [vmem:[%s293_s3 + $0x38] sm:$0xff]  ;;  %v82_v4 = vld [vmem:[%s293_s3 + $0x30] sm:$0xff]  ;;  %v30_v5 = vld [vmem:[%s291_s1] sm:$0xff] }
   0x3   :  { %157 = vmatpush.msra.mxu2 %v83_v3  ;;  %99 = vmatpush.msra.mxu1 %v83_v3 }
   0x4   :  { %154 = vmatpush.msra.mxu3 %v32_v1  ;;  %58 = vmatpush.msra.mxu0 %v32_v1 }
   0x5   :  { %10 = vsyncpa [#allocation4], 0  ;;  %vm25_vm0 = vcmask 261120   ;;  %v29_v6 = vld [vmem:[%s290_s0 + $0x8] sm:$0xff]  ;;  %v28_v7 = vld [vmem:[%s290_s0] sm:$0xff]  ;;  %158 = vmatpush.msra.mxu2 %v82_v4  ;;  %100 = vmatpush.msra.mxu1 %v82_v4  ;;  %v197_v14 = vmov 0.0  }
   0x6   :  { %155 = vmatpush.msra.mxu3 %v31_v2  ;;  %59 = vmatpush.msra.mxu0 %v31_v2  ;;  %v81_v8 = vld [vmem:[%s293_s3 + $0x28] sm:$0xff]  ;;  %v80_v9 = vld [vmem:[%s293_s3 + $0x20] sm:$0xff]  ;;  %v79_v10 = vld [vmem:[%s293_s3 + $0x18] sm:$0xff]  ;;  %26 = vst.msk [vmem:[#allocation2] sm:$0xff] %vm25_vm0, %v197_v14  ;;  %vm84_vm2 = vcmask 523264   ;;  %s198_s21 = smov [#allocation3]  }
   0x7   :  { %159 = vmatpush.msra.mxu2 %v81_v8  ;;  %101 = vmatpush.msra.mxu1 %v81_v8  ;;  %v78_v11 = vld [vmem:[%s293_s3 + $0x10] sm:$0xff]  ;;  %v77_v12 = vld [vmem:[%s293_s3 + $0x8] sm:$0xff]  ;;  %v76_v13 = vld [vmem:[%s293_s3] sm:$0xff]  ;;  %27 = vst.msk [vmem:[#allocation2 + $0x8] sm:$0xff] %vm25_vm0, %v197_v14  ;;  %s135_s22 = sshll.u32 %s198_s21, 4  ;;  %s137_s25 = sshll.u32 %s295_s5, 4  ;;  %s136_s22 = int_to_ptr.vmem [resolvable:$true] %s135_s22  ;;  %s138_s25 = int_to_ptr.hbm [resolvable:$true] %s137_s25 }
   0x8   :  { %156 = vmatpush.msra.mxu3 %v30_v5  ;;  %60 = vmatpush.msra.mxu0 %v30_v5  ;;  %v169_v15 = vld [vmem:[%s292_s2] ss:$0 sm:$0xff]  ;;  %s200_s26 = smov 8  }
   0x9   :  { %150 = vmatmul.msk.f32.vlgmr.msra.gmra.mxu3 %vm25_vm0, %v29_v6  ;;  %149 = vmatmul.msk.f32.vlgmr.msra.gmra.mxu0 %vm25_vm0, %v28_v7  ;;  %v170_v27 = vld [vmem:[%s294_s4] ss:$0 sm:$0xff]  ;;  %s199_s4 = smov 128  }
   0xa   :  { %160 = vmatpush.msra.mxu2 %v80_v9  ;;  %102 = vmatpush.msra.mxu1 %v80_v9 }
   0xc   :  { %161 = vmatpush.msra.mxu2 %v79_v10  ;;  %103 = vmatpush.msra.mxu1 %v79_v10 }
   0xd   :  { %v74_v24 = vld [vmem:[#allocation2] sm:$0xff] }
   0xe   :  { %162 = vmatpush.msra.mxu2 %v78_v11  ;;  %104 = vmatpush.msra.mxu1 %v78_v11  ;;  %v75_v28 = vld [vmem:[#allocation2 + $0x8] sm:$0xff] }
  0x10   :  { %163 = vmatpush.msra.mxu2 %v77_v12  ;;  %105 = vmatpush.msra.mxu1 %v77_v12 }
  0x12   :  { %164 = vmatpush.msra.mxu2 %v76_v13  ;;  %106 = vmatpush.msra.mxu1 %v76_v13 }
  0x86   :  { %v62_v16 = vpop.f32.mrf.mxu0 }
  0x87   :  { %v63_v17 = vadd.f32 %v169_v15, %v62_v16 }
  0x89   :  { %v70_v18 = vmul.f32 0.01, %v63_v17  ;;  %vm68_vm1 = vcmp.gt.f32.partialorder %v63_v17, 0.0 }
  0x8b   :  { %v72_v19 = vsel %vm68_vm1, %v63_v17, %v70_v18 }
  0x8c   :  { %v65_v20 = vpop.f32.mrf.mxu3  ;;  %151 = vmatmul.msk.f32.vlgmr.msra.gmra.mxu1 %vm84_vm2, %v72_v19 }
  0x8d   :  { %v66_v21 = vadd.f32 %v169_v15, %v65_v20 }
  0x8f   :  { %v71_v22 = vmul.f32 0.01, %v66_v21  ;;  %vm69_vm3 = vcmp.gt.f32.partialorder %v66_v21, 0.0 }
  0x91   :  { %v73_v23 = vsel %vm69_vm3, %v66_v21, %v71_v22 }
  0x92   :  { %152 = vmatmul.msk.f32.vlgmr.msra.gmra.mxu2 %vm84_vm2, %v73_v23 }
 0x109   :  { %v108_v25 = vpop.f32.mrf.mxu1 }
 0x10a   :  { %v114_v26 = vadd.f32 %v108_v25, %v74_v24 }
 0x10c   :  { %116 = vst.msk [vmem:[#allocation2] sm:$0xff] %vm25_vm0, %v114_v26 }
 0x113   :  { %v121_v29 = vld [vmem:[#allocation2] sm:$0xff] }
 0x114   :  { %v127_v30 = vadd.f32 %v170_v27, %v121_v29 }
 0x115   :  { %v111_v31 = vpop.f32.mrf.mxu2 }
 0x116   :  { %v115_v32 = vadd.f32 %v111_v31, %v75_v28  ;;  %129 = vst.msk [vmem:[#allocation3] sm:$0xff] %vm25_vm0, %v127_v30 }
 0x118   :  { %117 = vst.msk [vmem:[#allocation2 + $0x8] sm:$0xff] %vm25_vm0, %v115_v32 }
 0x11f   :  { %v122_v33 = vld [vmem:[#allocation2 + $0x8] sm:$0xff] }
 0x120   :  { %v128_v34 = vadd.f32 %v170_v27, %v122_v33 }
 0x122   :  { %130 = vst.msk [vmem:[#allocation3 + $0x8] sm:$0xff] %vm25_vm0, %v128_v34 }
 0x123   :  { %143 = dma.vmem_to_hbm [thread:$0]  %s136_s22, 256, %s138_s25, [#allocation4], %s199_s4, %s199_s4, %s200_s26  }
 0x124   :  { %195 = dma.done.wait [#allocation4], 256  }
 0x125   :  { %196 = vsyncadd [#allocation4], 4294967040 }
 0x126   :  { %148 = vsyncpa [#allocation4], 1 }

</bundles_post_ra>
